<compile_context>
chip_gen: v7x
topology: tpu7x:2x2x1
jax: 0.10.0
libtpu: 0.0.40
codegen_flags: <defaults>
</compile_context>

<pallas_src>
import functools

import jax
import jax.numpy as jnp
from jax.experimental import pallas as pl
from jax.experimental.pallas import tpu as pltpu

LANE = 128
NEG_BIG = -1e30    # online-softmax running-max init
NEG_FILL = -2e30   # masked-logit fill; strictly < NEG_BIG so exp(e - m) == 0


def _round_up(v, m):
    return ((v + m - 1) // m) * m


def _pick_tile(n_pad, want):
    t = want
    while t > LANE and n_pad % t != 0:
        t //= 2
    return min(t, n_pad)


def _const_spec(shape, index_map):
    """BlockSpec for a grid-invariant block: single-buffered (double-buffering a
    constant block doubles VMEM with zero DMA benefit)."""
    if hasattr(pl, "Buffered"):
        try:
            return pl.BlockSpec(shape, index_map, pipeline_mode=pl.Buffered(1))
        except TypeError:
            pass
    return pl.BlockSpec(shape, index_map)


def _vmem_limit_bytes():
    # ~75% of physical VMEM: ~48 MiB on v7x (64 MiB/TC), ~96 MiB on v5e/v6e.
    try:
        cap = pltpu.get_tpu_info().vmem_capacity_bytes
    except Exception:
        cap = 64 << 20
    return min(int(cap) * 3 // 4, 100 << 20)


# ----------------------------------------------------------------------------
# stage 1: xw = X @ W_gcn
# ----------------------------------------------------------------------------
def _xw_kernel(x_ref, w_ref, xw_ref):
    xw_ref[...] = jnp.dot(x_ref[...], w_ref[...],
                          preferred_element_type=jnp.float32).astype(xw_ref.dtype)


# ----------------------------------------------------------------------------
# stage 2: GCN aggregation (K-tiled) + ReLU + GAT projection + attention scalars
# ----------------------------------------------------------------------------
def _gcn_gat_proj_kernel(cnt_ref, ahat_ref, xw_ref, b_gcn_ref, w_gat_ref,
                         att_src_ref, att_dst_ref,
                         x2_ref, adst_ref, asrc_ref, acc_ref):
    qi = pl.program_id(0)
    ki = pl.program_id(1)

    @pl.when(ki == 0)
    def _():
        acc_ref[...] = jnp.zeros_like(acc_ref)

    @pl.when(cnt_ref[qi, ki] > 0)            # skip all-zero adjacency tiles
    def _():
        acc_ref[...] += jnp.dot(ahat_ref[...], xw_ref[...],
                                preferred_element_type=jnp.float32)

    @pl.when(ki == pl.num_programs(1) - 1)
    def _():
        h = jnp.maximum(acc_ref[...] + b_gcn_ref[...], 0.0)       # GCN bias + ReLU
        x2 = jnp.dot(h.astype(jnp.bfloat16), w_gat_ref[...],      # bf16 MXU operands
                     preferred_element_type=jnp.float32)          # (TQ, D_out) f32
        # per-node attention scalars: VPU multiply + row reduce (keeps MXU free)
        adst_ref[...] = jnp.sum(x2 * att_dst_ref[...], axis=-1, keepdims=True)
        asrc_ref[...] = jnp.sum(x2 * att_src_ref[...], axis=-1, keepdims=True)
        x2_ref[...] = x2.astype(x2_ref.dtype)


# ----------------------------------------------------------------------------
# stage 3: masked online-softmax attention + aggregation (flash-style)
# ----------------------------------------------------------------------------
def _gat_attn_kernel(cnt_ref, ahat_ref, adst_ref, asrc_ref, x2_ref, b_gat_ref,
                     out_ref, m_sc, l_sc, acc_sc, *, tk, x2_resident):
    qi = pl.program_id(0)
    ki = pl.program_id(1)

    @pl.when(ki == 0)
    def _():
        m_sc[...] = jnp.full_like(m_sc, NEG_BIG)
        l_sc[...] = jnp.zeros_like(l_sc)
        acc_sc[...] = jnp.zeros_like(acc_sc)

    @pl.when(cnt_ref[qi, ki] > 0)            # skip tiles containing no edges
    def _():
        mask = ahat_ref[...] > 0.0                       # edge (incl. self loop)
        e = adst_ref[...] + asrc_ref[...]                # (TQ, TK) f32 logits
        e = jnp.maximum(e, 0.2 * e)                      # leaky_relu, slope 0.2
        e = jnp.where(mask, e, NEG_FILL)

        m_new = jnp.maximum(m_sc[...], jnp.max(e, axis=-1, keepdims=True))
        alpha = jnp.exp(m_sc[...] - m_new)
        # NEG_FILL < NEG_BIG <= m_new  =>  masked entries underflow to exactly 0,
        # so no second select is needed for the probabilities.
        p = jnp.exp(e - m_new)
        l_sc[...] = alpha * l_sc[...] + jnp.sum(p, axis=-1, keepdims=True)

        if x2_resident:
            start = pl.multiple_of(ki * tk, tk)
            x2_blk = x2_ref[pl.ds(start, tk), :]
        else:
            x2_blk = x2_ref[...]
        acc_sc[...] = alpha * acc_sc[...] + jnp.dot(
            p.astype(jnp.bfloat16), x2_blk, preferred_element_type=jnp.float32)
        m_sc[...] = m_new

    @pl.when(ki == pl.num_programs(1) - 1)
    def _():
        # normalize once on the (TQ, D_out) accumulator; EUP approx reciprocal
        out_ref[...] = (acc_sc[...] * pl.reciprocal(l_sc[...], approx=True)
                        + b_gat_ref[...]).astype(out_ref.dtype)


# ----------------------------------------------------------------------------
# wrapper
# ----------------------------------------------------------------------------
def gnn_feature_transformer(x, a_hat, params):
    n, d_in = x.shape
    d_hid = params["w_gcn"].shape[1]
    d_out = params["w_gat"].shape[1]

    # n padded to a lane multiple so a_hat / a_src tiles are lane-dense
    n_pad = _round_up(n, LANE)
    d_in_p, d_hid_p, d_out_p = (_round_up(d, LANE) for d in (d_in, d_hid, d_out))

    # source/column tile (lane axis of a_hat tiles): big & multiple of 128
    tk = _pick_tile(n_pad, 512)
    # target/row tile: multiple of 16 (bf16 sublane packing); halve so the
    # leading "parallel" grid axis has >= 2 tiles (keeps both v7x TCs busy)
    tq = tk
    while n_pad // tq < 2 and tq >= 32:
        tq //= 2

    grid_rows = n_pad // tq
    grid_k = n_pad // tk

    # zero-pad features / weights to lane-dense, tile-aligned shapes
    xp = jnp.pad(x, ((0, n_pad - n), (0, d_in_p - d_in)))
    w_gcn = jnp.pad(params["w_gcn"], ((0, d_in_p - d_in), (0, d_hid_p - d_hid)))
    b_gcn = jnp.pad(params["b_gcn"], ((0, 0), (0, d_hid_p - d_hid)))
    w_gat = jnp.pad(params["w_gat"], ((0, d_hid_p - d_hid),
                                      (0, d_out_p - d_out))).astype(jnp.bfloat16)
    att_src = jnp.pad(params["att_src"], ((0, 0), (0, d_out_p - d_out)))
    att_dst = jnp.pad(params["att_dst"], ((0, 0), (0, d_out_p - d_out)))
    b_gat = jnp.pad(params["b_gat"], ((0, 0), (0, d_out_p - d_out)))

    ahat_f32 = jnp.pad(a_hat, ((0, n_pad - n), (0, n_pad - n)))
    if n_pad > n:   # keep padded rows non-empty (their output is sliced away)
        pad_idx = jnp.arange(n, n_pad)
        ahat_f32 = ahat_f32.at[pad_idx, pad_idx].set(1.0)

    # per-(row-tile, col-tile) edge counts -> stages 2 & 3 skip empty tiles
    counts = (ahat_f32 > 0.0).astype(jnp.int32).reshape(
        grid_rows, tq, grid_k, tk).sum(axis=(1, 3)).astype(jnp.int32)

    # bf16 halves NxN HBM/VMEM traffic. Norm coeffs are >= 1/N (far above bf16
    # underflow), so the >0 edge mask is preserved exactly.
    ahat = ahat_f32.astype(jnp.bfloat16)

    vmem_limit = _vmem_limit_bytes()

    # --- stage 1: xw = X @ W_gcn ---
    xw = pl.pallas_call(
        _xw_kernel,
        out_shape=jax.ShapeDtypeStruct((n_pad, d_hid_p), jnp.bfloat16),
        grid_spec=pltpu.PrefetchScalarGridSpec(
            num_scalar_prefetch=0, grid=(grid_rows,),
            in_specs=[pl.BlockSpec((tq, d_in_p), lambda i: (i, 0)),
                      _const_spec((d_in_p, d_hid_p), lambda i: (0, 0))],
            out_specs=pl.BlockSpec((tq, d_hid_p), lambda i: (i, 0))),
        compiler_params=pltpu.CompilerParams(
            dimension_semantics=("parallel",), vmem_limit_bytes=vmem_limit),
    )(xp, w_gcn)

    # --- stage 2: GCN aggregation + ReLU + GAT projection + attention scalars ---
    x2, a_dst, a_src_col = pl.pallas_call(
        _gcn_gat_proj_kernel,
        out_shape=(jax.ShapeDtypeStruct((n_pad, d_out_p), jnp.bfloat16),
                   jax.ShapeDtypeStruct((n_pad, 1), jnp.float32),
                   jax.ShapeDtypeStruct((n_pad, 1), jnp.float32)),
        grid_spec=pltpu.PrefetchScalarGridSpec(
            num_scalar_prefetch=1, grid=(grid_rows, grid_k),
            in_specs=[pl.BlockSpec((tq, tk), lambda qi, ki, cnt: (qi, ki)),
                      pl.BlockSpec((tk, d_hid_p), lambda qi, ki, cnt: (ki, 0)),
                      _const_spec((1, d_hid_p), lambda qi, ki, cnt: (0, 0)),
                      _const_spec((d_hid_p, d_out_p), lambda qi, ki, cnt: (0, 0)),
                      _const_spec((1, d_out_p), lambda qi, ki, cnt: (0, 0)),
                      _const_spec((1, d_out_p), lambda qi, ki, cnt: (0, 0))],
            out_specs=(pl.BlockSpec((tq, d_out_p), lambda qi, ki, cnt: (qi, 0)),
                       pl.BlockSpec((tq, 1), lambda qi, ki, cnt: (qi, 0)),
                       pl.BlockSpec((tq, 1), lambda qi, ki, cnt: (qi, 0))),
            scratch_shapes=[pltpu.VMEM((tq, d_hid_p), jnp.float32)]),
        compiler_params=pltpu.CompilerParams(
            dimension_semantics=("parallel", "arbitrary"),
            vmem_limit_bytes=vmem_limit),
    )(counts, ahat, xw, b_gcn, w_gat, att_src, att_dst)

    # tiny XLA reshape so stage 3 streams a_src as lane-dense (1, tk) rows
    a_src = a_src_col.reshape(1, n_pad)

    # --- stage 3: masked online-softmax attention + aggregation ---
    x2_resident = n_pad * d_out_p * 2 <= (8 << 20)   # keep x2 VMEM-resident if small
    if x2_resident:
        x2_spec = _const_spec((n_pad, d_out_p), lambda qi, ki, cnt: (0, 0))
    else:
        x2_spec = pl.BlockSpec((tk, d_out_p), lambda qi, ki, cnt: (ki, 0))

    out = pl.pallas_call(
        functools.partial(_gat_attn_kernel, tk=tk, x2_resident=x2_resident),
        out_shape=jax.ShapeDtypeStruct((n_pad, d_out_p), jnp.float32),
        grid_spec=pltpu.PrefetchScalarGridSpec(
            num_scalar_prefetch=1, grid=(grid_rows, grid_k),
            in_specs=[pl.BlockSpec((tq, tk), lambda qi, ki, cnt: (qi, ki)),    # a_hat
                      pl.BlockSpec((tq, 1), lambda qi, ki, cnt: (qi, 0)),      # a_dst
                      pl.BlockSpec((1, tk), lambda qi, ki, cnt: (0, ki)),      # a_src
                      x2_spec,                                                 # x2
                      _const_spec((1, d_out_p), lambda qi, ki, cnt: (0, 0))],  # b_gat
            out_specs=pl.BlockSpec((tq, d_out_p), lambda qi, ki, cnt: (qi, 0)),
            scratch_shapes=[pltpu.VMEM((tq, 1), jnp.float32),
                            pltpu.VMEM((tq, 1), jnp.float32),
                            pltpu.VMEM((tq, d_out_p), jnp.float32)]),
        compiler_params=pltpu.CompilerParams(
            dimension_semantics=("parallel", "arbitrary"),
            vmem_limit_bytes=vmem_limit),
    )(counts, ahat, a_dst, a_src, x2, b_gat)

    return out[:n, :d_out]


# ----------------------------------------------------------------------------
# JAX glue: dense symmetric-normalized adjacency (self-loops included)
# ----------------------------------------------------------------------------
def build_dense_graph(edge_index, num_nodes):
    src = edge_index[0]
    dst = edge_index[1]
    loop = jnp.arange(num_nodes, dtype=edge_index.dtype)
    src = jnp.concatenate([src, loop])
    dst = jnp.concatenate([dst, loop])
    ones = jnp.ones(src.shape[0], dtype=jnp.float32)

    deg = jnp.zeros((num_nodes,), jnp.float32).at[dst].add(ones)
    dinv = jnp.where(deg > 0.0, 1.0 / jnp.sqrt(deg), 0.0)
    norm = dinv[src] * dinv[dst]
    # a_hat[t, s] > 0 exactly where an edge s->t (incl. self loop) exists, so it
    # doubles as the GAT softmax mask — no separate adj array needed.
    a_hat = jnp.zeros((num_nodes, num_nodes), jnp.float32).at[dst, src].add(norm)
    return a_hat


def init_params(key, input_dim, hidden_dim, output_dim):
    def glorot(k, shape):
        fan_in, fan_out = shape[0], shape[-1]
        limit = jnp.sqrt(6.0 / (fan_in + fan_out))
        return jax.random.uniform(k, shape, jnp.float32, -limit, limit)

    k = jax.random.split(key, 4)
    return {
        "w_gcn": glorot(k[0], (input_dim, hidden_dim)),
        "b_gcn": jnp.zeros((1, hidden_dim), jnp.float32),
        "w_gat": glorot(k[1], (hidden_dim, output_dim)),
        "att_src": glorot(k[2], (1, output_dim)),
        "att_dst": glorot(k[3], (1, output_dim)),
        "b_gat": jnp.zeros((1, output_dim), jnp.float32),
    }


if __name__ == "__main__":
    num_nodes, input_dim, hidden_dim, output_dim = 8, 16, 32, 16

    key = jax.random.PRNGKey(0)
    kx, kp = jax.random.split(key)

    x = jax.random.normal(kx, (num_nodes, input_dim), jnp.float32)

    # small directed ring graph (both directions): 2 * num_nodes edges
    idx = jnp.arange(num_nodes, dtype=jnp.int32)
    nxt = (idx + 1) % num_nodes
    edge_index = jnp.stack([
        jnp.concatenate([idx, nxt]),   # source nodes
        jnp.concatenate([nxt, idx]),   # target nodes
    ])

    params = init_params(kp, input_dim, hidden_dim, output_dim)
    a_hat = build_dense_graph(edge_index, num_nodes)

    out = gnn_feature_transformer(x, a_hat, params)
    jax.block_until_ready(out)

    assert out.shape == (num_nodes, output_dim)
    assert bool(jnp.all(jnp.isfinite(out)))
    print("KERNEL_OK")
</pallas_src>

<mosaic_0001>
module attributes {stable_mosaic.version = 11 : i64} {
  func.func @_xw_kernel(%arg0: i32, %arg1: memref<64x128xf32, #tpu.memory_space<vmem>>, %arg2: memref<128x128xf32, #tpu.memory_space<vmem>>, %arg3: memref<64x128xbf16, #tpu.memory_space<vmem>>) attributes {dimension_semantics = [#tpu.dimension_semantics<parallel>], iteration_bounds = array<i64: 2>, scalar_prefetch = 0 : i64, scratch_operands = 0 : i64, tpu.core_type = #tpu.core_type<tc>, window_params = [{transform_indices = @transform_0, window_bounds = array<i64: 64, 128>}, {pipeline_mode = #tpu.pipeline_mode<synchronous>, transform_indices = @transform_1, window_bounds = array<i64: 128, 128>}, {transform_indices = @transform_2, window_bounds = array<i64: 64, 128>}]} {
    %c0 = arith.constant 0 : index
    %c0_0 = arith.constant 0 : index
    %0 = vector.load %arg1[%c0, %c0_0] : memref<64x128xf32, #tpu.memory_space<vmem>>, vector<64x128xf32>
    %c0_1 = arith.constant 0 : index
    %c0_2 = arith.constant 0 : index
    %1 = vector.load %arg2[%c0_1, %c0_2] : memref<128x128xf32, #tpu.memory_space<vmem>>, vector<128x128xf32>
    %cst = arith.constant dense<0.000000e+00> : vector<64x128xf32>
    %2 = tpu.matmul %0, %1, %cst {dimension_numbers = #tpu.dot_dimension_numbers<[1], [0], [0], [1], [0, 0, 1, 1], [], []>} : vector<64x128xf32>, vector<128x128xf32>, vector<64x128xf32> -> vector<64x128xf32>
    %3 = arith.truncf %2 : vector<64x128xf32> to vector<64x128xbf16>
    %c0_3 = arith.constant 0 : index
    %c0_4 = arith.constant 0 : index
    %4 = vector.load %arg3[%c0_3, %c0_4] : memref<64x128xbf16, #tpu.memory_space<vmem>>, vector<64x128xbf16>
    tpu.vector_store %arg3[%c0_3, %c0_4], %3 {strides = array<i32>} : memref<64x128xbf16, #tpu.memory_space<vmem>>, vector<64x128xbf16>,
    return
  }
  func.func @transform_0(%arg0: i32) -> (i32, i32) {
    %c0_i32 = arith.constant 0 : i32
    %c0_i32_0 = arith.constant 0 : i32
    return %arg0, %c0_i32 : i32, i32
  }
  func.func @transform_1(%arg0: i32) -> (i32, i32) {
    %c0_i32 = arith.constant 0 : i32
    %c0_i32_0 = arith.constant 0 : i32
    %c0_i32_1 = arith.constant 0 : i32
    return %c0_i32, %c0_i32_0 : i32, i32
  }
  func.func @transform_2(%arg0: i32) -> (i32, i32) {
    %c0_i32 = arith.constant 0 : i32
    %c0_i32_0 = arith.constant 0 : i32
    return %arg0, %c0_i32 : i32, i32
  }
}

</mosaic_0001>

<bundles_post_ra>
// kernel: tpu_custom_call.1
= control target key start
LH: loop header
LB: loop body
LE: loop exit
PB: predicated region body
PF: predicated region fallthrough
CT: control target
= control target key end

     0   :  { %7 = vsyncpa [#allocation3], 0  ;;  %s1049_s0 = inlined_call_operand.hbm [shape: f32[128,128], index: 0, kind: input, shape index: {}]   ;;  %s1050_s1 = inlined_call_operand.hbm [shape: f32[128,128], index: 1, kind: input, shape index: {}]   ;;  %s1051_s2 = inlined_call_operand.hbm [shape: bf16[128,128], index: 2, kind: output, shape index: {}]  }
   0x1   :  { %9 = vsyncpa [#allocation3 + $0x1], 0 }
   0x2   :  { %10 = vsyncpa [#allocation6], 0 }
   0x3   :  { %11 = vsyncpa [#allocation4], 0 }
   0x4   :  { %13 = vsyncpa [#allocation4 + $0x1], 0  ;;  %s831_s9 = smov 0   ;;  %s833_s10 = smov 0  }
   0x5   :  { %s835_s11 = smov 0   ;;  %s837_s12 = smov 0  }
   0x6 LB: > { %s852_s13 = sadd.s32 4294967295, %s807_s12   ;;  %s445_s14 = sadd.s32 4294967294, %s807_s12   ;;  %s807_s12 = sphi %s837_s12, %s1071_s12   ;;  %s803_s11 = sphi %s835_s11, %s1070_s11   ;;  %s799_s10 = sphi %s833_s10, %s1069_s10   ;;  %s795_s9 = sphi %s831_s9, %s1068_s9  }
   0x7   : > { %p39_p0 = scmp.ne.s32.totalorder %s799_s10, %s795_s9  ;;  %p1052_p1 = scmp.eq.s32.totalorder %s852_s13, 0 }
   0x8   : > { %p90_p3 = scmp.eq.s32.totalorder %s445_s14, 1  ;;  %p446_p5 = scmp.ge.s32.totalorder %s807_s12, 1 }
   0x9   : > { %p861_p4 = por %p1052_p1, %p39_p0  ;;  %p97_p7 = scmp.lt.s32.totalorder %s807_s12, 3 }
   0xa   : > { %p866_p6 = por %p90_p3, %p39_p0  ;;  %s809_s18 = smov [#allocation5]  }
   0xb   : > { %s1055_s15 = scalar_select %p861_p4, 1, 0 }
   0xc   : > { %s1056_s16 = scalar_select %p866_p6, 1, 0 }
   0xd   : > { %p871_p8 = pnand %p446_p5, %p97_p7  ;;  %s109_s19 = sshll.u32 %s809_s18, 4  ;;  %s875_s19 = int_to_ptr.vmem [resolvable:$true] %s109_s19 }
   0xe   : > { %s887_s21 = sadd.s32 1, %s807_s12   ;;  %s26_s22 = sadd.s32 1, %s803_s11 }
   0xf   : > { %s1057_s17 = scalar_select %p871_p8, 1, 0 }
  0x10   : > { %p626_p9 = pneg %p871_p8  ;;  %s23_s23 = ssub.s32 %s807_s12, %s887_s21 }
  0x11   : > { %s679_s26 = scalar_lea.hbm %s1050_s1, 2048 }
  0x12   : > { %p882_p11 = pnand %p626_p9, %p1052_p1  ;;  %p680_p12 = scmp.ne.s32.totalorder %s1050_s1, %s679_s26 }
  0x13   : > { %p686_p5 = scmp.lt.u32.totalorder %s679_s26, %s1050_s1 }
  0x14   : > { %p681_p13 = pneg %p882_p11 }
  0x16   : > { %p682_p0 = pnand %p681_p13, %p680_p12 }
  0x18   : > { %p683_p3 = pneg %p682_p0 }
  0x1a   : > { %p688_p7 = pnand %p686_p5, %p683_p3 }
  0x1c   : > { %691 = shalt.err (!%p688_p7)
}
  0x1d   : > { %s692_s3 = scalar_lea.vmem %s875_s19, 2048  ;;  %p700_p2 = scmp.lt.s32.totalorder %s875_s19, %s875_s19 }
  0x1e   : > { %p693_p9 = scmp.ne.s32.totalorder %s875_s19, %s692_s3  ;;  %p701_p6 = scmp.lt.s32.totalorder %s692_s3, %s692_s3 }
  0x20   : > { %p695_p10 = pnand %p693_p9, %p681_p13  ;;  %p702_p4 = por %p701_p6, %p700_p2 }
  0x22   : > { %p696_p1 = pneg %p695_p10 }
  0x24   : > { %p703_p8 = pnand %p702_p4, %p696_p1 }
  0x26   : > { %706 = shalt.err (!%p703_p8)
}
  0x27   : > { %s810_s4 = smov 128   ;;  %s811_s5 = smov 8  }
  0x28   : > { %629 = dma.hbm_to_vmem [thread:$0]  (!%p882_p11), %s1050_s1, 2048, %s875_s19, [#allocation6], %s810_s4, %s810_s4, %s811_s5  }
  0x29   : > { %p24_p1 = scmp.eq.s32.totalorder %s23_s23, 0  ;;  %p33_p2 = scmp.ne.s32.totalorder %s803_s11, %s799_s10 }
  0x2a   : > { %p34_p4 = scmp.eq.s32.totalorder %s807_s12, 0  ;;  %p639_p6 = scmp.lt.s32.totalorder %s807_s12, 2 }
  0x2b   : > { %s921_s8 = scalar_select %p24_p1, %s803_s11, %s26_s22  }
  0x2c   : > { %p35_p8 = por %p34_p4, %p33_p2  ;;  %p1059_p10 = scmp.eq.s32.totalorder %s852_s13, 1 }
  0x2d   : > { %s123_s18 = sand.u32 1, %s803_s11   ;;  %s469_s20 = sshll.u32 %s807_s12, 10 }
  0x2e   : > { %p925_p12 = por %p1059_p10, %p33_p2  ;;  %s449_s24 = sshll.u32 %s123_s18, 6 }
  0x2f   : > { %s934_s27 = scalar_lea.hbm %s1049_s0, %s469_s20  ;;  %s127_s19 = scalar_lea.vmem [#allocation2], %s449_s24 }
  0x30   : > { %s134_s22 = sshll.u32 %s127_s19, 4  ;;  %p936_p11 = pnand %p639_p6, %p35_p8  ;;  %s940_s22 = int_to_ptr.vmem [resolvable:$true] %s134_s22 }
  0x31   : > { %s942_s28 = scalar_lea.sflag [#allocation3], %s123_s18  ;;  %s707_s29 = scalar_lea.hbm %s934_s27, 1024 }
  0x32   : > { %p708_p13 = scmp.ne.s32.totalorder %s934_s27, %s707_s29  ;;  %p709_p0 = pneg %p936_p11 }
  0x33   : > { %s712_s6 = scalar_lea.hbm %s1049_s0, 2048  ;;  %p713_p7 = scmp.lt.u32.totalorder %s934_s27, %s1049_s0 }
  0x34   : > { %p710_p3 = pnand %p709_p0, %p708_p13  ;;  %p714_p9 = scmp.lt.u32.totalorder %s712_s6, %s707_s29 }
  0x35   : > { %p716_p2 = scmp.lt.u32.totalorder %s707_s29, %s934_s27 }
  0x36   : > { %p711_p5 = pneg %p710_p3  ;;  %p715_p1 = por %p714_p9, %p713_p7 }
  0x38   : > { %p717_p4 = por %p716_p2, %p715_p1 }
  0x3a   : > { %p718_p6 = pnand %p717_p4, %p711_p5 }
  0x3c   : > { %721 = shalt.err (!%p718_p6)
}
  0x3d   : > { %s722_s18 = scalar_lea.vmem %s940_s22, 1024  ;;  %s812_s24 = smov [#allocation2]  }
  0x3e   : > { %p723_p8 = scmp.ne.s32.totalorder %s940_s22, %s722_s18  ;;  %s727_s25 = sshll.u32 %s812_s24, 4  ;;  %s728_s25 = int_to_ptr.vmem [resolvable:$false] %s727_s25 }
  0x3f   : > { %s729_s26 = scalar_lea.vmem %s728_s25, 2048  ;;  %p730_p3 = scmp.lt.s32.totalorder %s940_s22, %s728_s25 }
  0x40   : > { %p725_p10 = pnand %p723_p8, %p709_p0  ;;  %p731_p7 = scmp.lt.s32.totalorder %s729_s26, %s722_s18 }
  0x42   : > { %p726_p13 = pneg %p725_p10  ;;  %p732_p9 = por %p731_p7, %p730_p3 }
  0x44   : > { %p733_p1 = pnand %p732_p9, %p726_p13 }
  0x46   : > { %736 = shalt.err (!%p733_p1)
}
  0x47   : > { %633 = dma.hbm_to_vmem [thread:$0]  (!%p936_p11), %s934_s27, 1024, %s940_s22, %s942_s28, %s810_s4, %s810_s4, %s811_s5  }
  0x48   : > { %p1062_p0 = scmp.ne.s32.totalorder %s1057_s17, 0 }
  0x49   : > { %s976_s19 = sand.u32 (!%p1062_p0), 1, %s799_s10   ;;  %p1063_p5 = scmp.ne.s32.totalorder (!%p1062_p0), %s1055_s15, 0 }
  0x4a   : > { %146 = sbr.rel (%p1062_p0) target bundleno = 354 (0x162), region = 28  ;;  %s453_s29 = sshll.u32 (!%p1062_p0), %s976_s19, 6 }
  0x4b   : > { %s149_s30 = scalar_lea.sflag (!%p1062_p0), [#allocation3], %s976_s19  ;;  %s980_s3 = scalar_lea.vmem (!%p1062_p0), [#allocation2], %s453_s29 }
  0x51   : > { %782 = dma.done.wait (%p1063_p5), %s149_s30, 1024  }
  0x52   : > { %784 = vsyncadd (%p1063_p5), %s149_s30, 4294966272  ;;  %p1064_p11 = scmp.eq.s32.totalorder %s852_s13, 0 }
  0x54   : > { %786 = dma.done.wait (%p1064_p11), [#allocation6], 2048   ;;  %p1065_p2 = pmov %p1064_p11 }
  0x55   : > { %v187_v0 = vld [vmem:[#allocation5] sm:$0xff]  ;;  %v188_v1 = vld [vmem:[#allocation5 + $0x8] sm:$0xff]  ;;  %v189_v2 = vld [vmem:[#allocation5 + $0x10] sm:$0xff]  ;;  %s455_s15 = sshll.u32 %s976_s19, 5  ;;  %s478_s5 = sshll.u32 %s852_s13, 9 }
  0x56   : > { %788 = vsyncadd (%p1065_p2), [#allocation6], 4294965248  ;;  %v570_v3 = vpack.c.bf16 %v188_v1, %v187_v0  ;;  %v190_v4 = vld [vmem:[#allocation5 + $0x18] sm:$0xff]  ;;  %v191_v6 = vld [vmem:[#allocation5 + $0x20] sm:$0xff]  ;;  %s176_s17 = scalar_lea.vmem [#allocation7], %s455_s15  ;;  %s1005_s23 = scalar_lea.hbm %s1051_s2, %s478_s5 }
  0x57   : > { %v574_v5 = vpack.c.bf16 %v190_v4, %v189_v2  ;;  %v192_v7 = vld [vmem:[#allocation5 + $0x28] sm:$0xff]  ;;  %v179_v9 = vld [vmem:[%s980_s3] sm:$0xff]  ;;  %v193_v11 = vld [vmem:[#allocation5 + $0x30] sm:$0xff]  ;;  %s362_s4 = sshll.u32 %s176_s17, 4  ;;  %s349_s13 = scalar_lea.sflag [#allocation4], %s976_s19  ;;  %s1000_s4 = int_to_ptr.vmem [resolvable:$true] %s362_s4 }
  0x58   : > { %571 = vmatprep.subr.bf16.mxu0 %v570_v3  ;;  %602 = vmatprep.subr.bf16.mxu1 %v570_v3  ;;  %v578_v8 = vpack.c.bf16 %v192_v7, %v191_v6  ;;  %v183_v10 = vld [vmem:[%s980_s3 + $0x20] sm:$0xff]  ;;  %v194_v12 = vld [vmem:[#allocation5 + $0x38] sm:$0xff]  ;;  %v196_v15 = vld [vmem:[#allocation5 + $0x48] sm:$0xff]  ;;  %s737_s28 = scalar_lea.vmem %s1000_s4, 512  ;;  %s813_s6 = smov [#allocation7]  }
  0x59   : > { %573 = vmatpush3.bf16.msra.mxu0 %v570_v3  ;;  %610 = vmatpush3.bf16.msra.mxu1 %v570_v3  ;;  %v582_v13 = vpack.c.bf16 %v194_v12, %v193_v11  ;;  %v195_v14 = vld [vmem:[#allocation5 + $0x40] sm:$0xff]  ;;  %v197_v17 = vld [vmem:[#allocation5 + $0x50] sm:$0xff]  ;;  %v198_v18 = vld [vmem:[#allocation5 + $0x58] sm:$0xff]  ;;  %p738_p4 = scmp.ne.s32.totalorder %s1000_s4, %s737_s28  ;;  %s741_s7 = sshll.u32 %s813_s6, 4  ;;  %s742_s7 = int_to_ptr.vmem [resolvable:$false] %s741_s7 }
  0x5a   : > { %575 = vmatprep.subr.bf16.mxu0 %v574_v5  ;;  %603 = vmatprep.subr.bf16.mxu1 %v574_v5  ;;  %v586_v16 = vpack.c.bf16 %v196_v15, %v195_v14  ;;  %v590_v19 = vpack.c.bf16 %v198_v18, %v197_v17  ;;  %v199_v20 = vld [vmem:[#allocation5 + $0x60] sm:$0xff]  ;;  %v200_v21 = vld [vmem:[#allocation5 + $0x68] sm:$0xff]  ;;  %v201_v23 = vld [vmem:[#allocation5 + $0x70] sm:$0xff]  ;;  %s743_s20 = scalar_lea.vmem %s742_s7, 1024  ;;  %p744_p10 = scmp.lt.s32.totalorder %s1000_s4, %s742_s7 }
  0x5b   : > { %558 = vmatprep.mubr.f32.mxu0 %v179_v9  ;;  %564 = vmatprep.mubr.f32.mxu1 %v183_v10  ;;  %v594_v22 = vpack.c.bf16 %v200_v21, %v199_v20  ;;  %v202_v24 = vld [vmem:[#allocation5 + $0x78] sm:$0xff]  ;;  %v180_v26 = vld [vmem:[%s980_s3 + $0x8] sm:$0xff]  ;;  %v181_v28 = vld [vmem:[%s980_s3 + $0x10] sm:$0xff]  ;;  %p739_p6 = pnand %p738_p4, %p925_p12  ;;  %p745_p13 = scmp.lt.s32.totalorder %s743_s20, %s737_s28 }
  0x5c   : > { %v598_v25 = vpack.c.bf16 %v202_v24, %v201_v23  ;;  %v184_v27 = vld [vmem:[%s980_s3 + $0x28] sm:$0xff]  ;;  %v185_v29 = vld [vmem:[%s980_s3 + $0x30] sm:$0xff]  ;;  %v182_v30 = vld [vmem:[%s980_s3 + $0x18] sm:$0xff] }
  0x5d   : > { %577 = vmatpush3.bf16.msra.mxu0 %v574_v5  ;;  %611 = vmatpush3.bf16.msra.mxu1 %v574_v5  ;;  %v186_v31 = vld [vmem:[%s980_s3 + $0x38] sm:$0xff]  ;;  %p740_p8 = pneg %p739_p6  ;;  %p746_p3 = por %p745_p13, %p744_p10 }
  0x5e   : > { %579 = vmatprep.subr.bf16.mxu0 %v578_v8  ;;  %604 = vmatprep.subr.bf16.mxu1 %v578_v8 }
  0x5f   : > { %p747_p7 = pnand %p746_p3, %p740_p8 }
  0x61   : > { %581 = vmatpush3.bf16.msra.mxu0 %v578_v8  ;;  %612 = vmatpush3.bf16.msra.mxu1 %v578_v8 }
  0x62   : > { %583 = vmatprep.subr.bf16.mxu0 %v582_v13  ;;  %605 = vmatprep.subr.bf16.mxu1 %v582_v13 }
  0x65   : > { %585 = vmatpush3.bf16.msra.mxu0 %v582_v13  ;;  %613 = vmatpush3.bf16.msra.mxu1 %v582_v13 }
  0x66   : > { %587 = vmatprep.subr.bf16.mxu0 %v586_v16  ;;  %606 = vmatprep.subr.bf16.mxu1 %v586_v16 }
  0x69   : > { %589 = vmatpush3.bf16.msra.mxu0 %v586_v16  ;;  %614 = vmatpush3.bf16.msra.mxu1 %v586_v16 }
  0x6a   : > { %591 = vmatprep.subr.bf16.mxu0 %v590_v19  ;;  %607 = vmatprep.subr.bf16.mxu1 %v590_v19 }
  0x6d   : > { %593 = vmatpush3.bf16.msra.mxu0 %v590_v19  ;;  %615 = vmatpush3.bf16.msra.mxu1 %v590_v19 }
  0x6e   : > { %595 = vmatprep.subr.bf16.mxu0 %v594_v22  ;;  %608 = vmatprep.subr.bf16.mxu1 %v594_v22 }
  0x71   : > { %597 = vmatpush3.bf16.msra.mxu0 %v594_v22  ;;  %616 = vmatpush3.bf16.msra.mxu1 %v594_v22 }
  0x72   : > { %599 = vmatprep.subr.bf16.mxu0 %v598_v25  ;;  %609 = vmatprep.subr.bf16.mxu1 %v598_v25 }
  0x75   : > { %601 = vmatpush3.bf16.msra.mxu0 %v598_v25  ;;  %617 = vmatpush3.bf16.msra.mxu1 %v598_v25 }
  0x78   : > { %559 = vmatmul.mubr.f32.vlgmr.msra.gmra.mrb[0].mxu0 %v180_v26  ;;  %565 = vmatmul.mubr.f32.vlgmr.msra.gmra.mrb[0].mxu1 %v184_v27 }
  0x79   : > { %561 = vmatprep.mubr.f32.mxu0 %v181_v28  ;;  %567 = vmatprep.mubr.f32.mxu1 %v185_v29 }
  0x7c   : > { %562 = vmatmul.mubr.f32.gmra.mrb[2].mxu0 %v182_v30  ;;  %568 = vmatmul.mubr.f32.gmra.mrb[2].mxu1 %v186_v31 }
 0x14b   : > { %v560_v32 = vpop.f32.mrb[0].mxu0  ;;  %v566_v33 = vpop.f32.mrb[0].mxu1 }
 0x14c   : > { %v269_v34 = vpop.f32.mrb[1].mxu0  ;;  %v289_v35 = vpop.f32.mrb[1].mxu1 }
 0x14d   : > { %v482_v36 = vpack.c.bf16 %v560_v32, %v269_v34  ;;  %v492_v37 = vpack.c.bf16 %v566_v33, %v289_v35 }
 0x14f   : > { %483 = vst [vmem:[%s176_s17] sm:$0xff] %v482_v36   ;;  %500 = vst [vmem:[%s176_s17 + $0x10] sm:$0xff] %v492_v37   ;;  %v563_v38 = vpop.f32.mrb[2].mxu0  ;;  %v569_v39 = vpop.f32.mrb[2].mxu1 }
 0x150   : > { %v279_v40 = vpop.f32.mrb[3].mxu0  ;;  %v299_v41 = vpop.f32.mrb[3].mxu1 }
 0x151   : > { %v487_v42 = vpack.c.bf16 %v563_v38, %v279_v40  ;;  %v497_v43 = vpack.c.bf16 %v569_v39, %v299_v41 }
 0x153   : > { %499 = vst [vmem:[%s176_s17 + $0x8] sm:$0xff] %v487_v42   ;;  %501 = vst [vmem:[%s176_s17 + $0x18] sm:$0xff] %v497_v43  }
 0x154   : > { %750 = shalt.err (!%p747_p7)
}
 0x155   : > { %s751_s18 = scalar_lea.hbm %s1005_s23, 512  ;;  %s755_s26 = scalar_lea.hbm %s1051_s2, 1024 }
 0x156   : > { %p752_p9 = scmp.ne.s32.totalorder %s1005_s23, %s751_s18  ;;  %p756_p5 = scmp.lt.u32.totalorder %s1005_s23, %s1051_s2 }
 0x157   : > { %p757_p11 = scmp.lt.u32.totalorder %s755_s26, %s751_s18  ;;  %p759_p4 = scmp.lt.u32.totalorder %s751_s18, %s1005_s23 }
 0x158   : > { %p753_p1 = pnand %p752_p9, %p925_p12 }
 0x159   : > { %p758_p2 = por %p757_p11, %p756_p5 }
 0x15a   : > { %p754_p0 = pneg %p753_p1 }
 0x15b   : > { %p760_p6 = por %p759_p4, %p758_p2 }
 0x15d   : > { %p761_p8 = pnand %p760_p6, %p754_p0 }
 0x15f   : > { %764 = shalt.err (!%p761_p8)
}
 0x160   : > { %s814_s3 = smov 64   ;;  %s815_s15 = smov 4  }
 0x161   : > { %624 = dma.vmem_to_hbm [thread:$0]  (%p925_p12), %s1000_s4, 512, %s1005_s23, %s349_s13, %s814_s3, %s814_s3, %s815_s15  }
 0x162 PF: > { %s377_s17 = sand.u32 1, %s795_s9   ;;  %p1066_p10 = scmp.ne.s32.totalorder %s1056_s16, 0 }
 0x163   : > { %p1067_p13 = scmp.ge.s32.totalorder %s807_s12, 2  ;;  %s378_s5 = scalar_lea.sflag [#allocation4], %s377_s17 }
 0x165   : > { %p635_p3 = pnand %p1067_p13, %p1066_p10 }
 0x167   : > { %790 = dma.done.wait (!%p635_p3), %s378_s5, 512  }
 0x168   : > { %792 = vsyncadd (!%p635_p3), %s378_s5, 4294966784  ;;  %p16_p7 = scmp.ge.s32.totalorder %s887_s21, 4   ;;  %s1068_s9 = smov %s799_s10 }
 0x169   : > { %s1069_s10 = smov %s803_s11  ;;  %s1070_s11 = smov %s921_s8 }
 0x16a   : > { %s1071_s12 = smov %s887_s21  ;;  %18 = sbr.rel (!%p16_p7) target bundleno = 6 (0x6), region = 77 }
 0x171   :  { %383 = vsyncpa [#allocation3], 1 }
 0x172   :  { %385 = vsyncpa [#allocation3 + $0x1], 1 }
 0x173   :  { %386 = vsyncpa [#allocation6], 1 }
 0x174   :  { %387 = vsyncpa [#allocation4], 1 }
 0x175   :  { %389 = vsyncpa [#allocation4 + $0x1], 1 }

</bundles_post_ra>
